<compile_context>
chip_gen: v6e
topology: v6e:2x2x1
jax: 0.10.0
libtpu: 0.0.40
codegen_flags: <defaults>
</compile_context>

<pallas_src>
import math
import jax
import jax.numpy as jnp
from jax.experimental import pallas as pl
from jax.experimental.pallas import tpu as pltpu


def _round_up(x, m):
    return ((x + m - 1) // m) * m


def _cdiv(a, b):
    return -(-a // b)


# -----------------------------------------------------------------------------
# Kernel
# -----------------------------------------------------------------------------
def ffn_kernel(x_ref, w1_ref, b1_ref, w2_ref, b2_ref, o_ref, acc_ref):
    """Grid = (row tiles, d_ff tiles).  Axis 1 is the d_ff reduction."""
    k = pl.program_id(1)

    @pl.when(k == 0)
    def _():
        # Seed the accumulator with b2 so the epilogue is a plain cast+store.
        acc_ref[...] = jnp.broadcast_to(
            b2_ref[...].astype(jnp.float32), acc_ref.shape)

    # First linear over this d_ff tile + bias + ReLU (MXU + VPU), f32 accumulate.
    h = jnp.dot(x_ref[...], w1_ref[...], preferred_element_type=jnp.float32)
    h = jnp.maximum(h + b1_ref[...], 0.0)

    # Partial second linear for this d_ff tile, accumulated in f32 scratch.
    acc_ref[...] += jnp.dot(h.astype(w2_ref.dtype), w2_ref[...],
                            preferred_element_type=jnp.float32)

    @pl.when(k == pl.num_programs(1) - 1)
    def _():
        o_ref[...] = acc_ref[...].astype(o_ref.dtype)


# -----------------------------------------------------------------------------
# VMEM budget / tile selection
# -----------------------------------------------------------------------------
def _vmem_budget_and_limit(vmem_budget_bytes):
    if vmem_budget_bytes is not None:
        return vmem_budget_bytes, vmem_budget_bytes + (16 << 20)
    try:
        info = pltpu.get_tpu_info()
        cap = getattr(info, "vmem_capacity_bytes", None) or (64 << 20)
    except Exception:
        cap = 64 << 20  # conservative (v7x per-core VMEM)
    return int(cap * 0.60), int(cap * 0.85)


def _choose_tiles(M, d_model_p, d_ff_p, in_itemsize, w_itemsize, out_itemsize,
                  budget):
    """Pick (tm, tk): MXU-friendly 128-multiples that fit the VMEM budget.

    tk must divide d_ff_p (so padding can be done once, out of the hot path).
    Prefers tk = d_ff_p (no reduction axis / no weight re-streaming); under
    pressure prefers keeping tk >= 512 and shrinking tm first, but always keeps
    >= 2 row tiles when M > 128 so both v7x TensorCores get work.
    """
    tm = min(512, _round_up(max(M, 1), 128))
    if M > 128:
        tm = min(tm, max(128, _round_up(_cdiv(M, 2), 128)))

    n = d_ff_p // 128
    tk_cands = sorted({128 * d for d in range(1, n + 1) if n % d == 0},
                      reverse=True)

    headroom = 2 << 20  # Mosaic internal scratch / misc

    def vmem_bytes(tm_, tk_):
        x_b = 2 * tm_ * d_model_p * in_itemsize        # double-buffered x tile
        w1_b = 2 * d_model_p * tk_ * w_itemsize        # W1 column tile
        w2_b = 2 * tk_ * d_model_p * w_itemsize        # W2 row tile
        b_b = 2 * (tk_ + d_model_p) * 4                # biases (f32)
        o_b = 2 * tm_ * d_model_p * out_itemsize       # output tile
        acc_b = tm_ * d_model_p * 4                    # f32 accumulator scratch
        h_b = tm_ * tk_ * (4 + w_itemsize)             # f32 h + bf16 cast copy
        return x_b + w1_b + w2_b + b_b + o_b + acc_b + h_b + headroom

    while True:
        fits = [tk for tk in tk_cands if vmem_bytes(tm, tk) <= budget]
        if fits and (fits[0] >= 512 or tm <= 128):
            return tm, fits[0]
        if tm <= 128:
            return tm, (fits[0] if fits else tk_cands[-1])
        tm = max(128, _round_up(_cdiv(tm, 2), 128))


# -----------------------------------------------------------------------------
# Parameter prep (done once, outside the per-call hot path)
# -----------------------------------------------------------------------------
def prepare_ffn_params(w1, b1, w2, b2, *, compute_dtype=jnp.bfloat16):
    """Pad weights to lane-dense 128-multiples and cast to the compute dtype.

    Zero padding is exact: padded d_model columns / d_ff slots contribute
    relu(0)*0 = 0 to real outputs.
    """
    d_model, d_ff = w1.shape
    d_model_p = _round_up(d_model, 128)
    d_ff_p = _round_up(d_ff, 128)

    if d_model_p != d_model or d_ff_p != d_ff:
        w1 = jnp.pad(w1, ((0, d_model_p - d_model), (0, d_ff_p - d_ff)))
        w2 = jnp.pad(w2, ((0, d_ff_p - d_ff), (0, d_model_p - d_model)))
    b1p = b1.reshape(1, d_ff)
    b2p = b2.reshape(1, d_model)
    if d_ff_p != d_ff:
        b1p = jnp.pad(b1p, ((0, 0), (0, d_ff_p - d_ff)))
    if d_model_p != d_model:
        b2p = jnp.pad(b2p, ((0, 0), (0, d_model_p - d_model)))

    return dict(
        w1=w1.astype(compute_dtype),
        b1=b1p.astype(jnp.float32),
        w2=w2.astype(compute_dtype),
        b2=b2p.astype(jnp.float32),
        d_model=d_model, d_ff=d_ff,
        d_model_p=d_model_p, d_ff_p=d_ff_p,
        compute_dtype=compute_dtype,
    )


# -----------------------------------------------------------------------------
# Forward
# -----------------------------------------------------------------------------
def feed_forward(x, params, *, vmem_budget_bytes=None):
    """x: (..., d_model) -> (..., d_model)."""
    lead = x.shape[:-1]
    d_model = x.shape[-1]
    assert d_model == params["d_model"]
    d_model_p = params["d_model_p"]
    d_ff_p = params["d_ff_p"]
    compute_dtype = params["compute_dtype"]
    out_dtype = x.dtype

    M = 1
    for s in lead:
        M *= s

    in_itemsize = jnp.dtype(compute_dtype).itemsize
    w_itemsize = jnp.dtype(compute_dtype).itemsize
    out_itemsize = jnp.dtype(out_dtype).itemsize

    budget, vmem_limit = _vmem_budget_and_limit(vmem_budget_bytes)
    tm, tk = _choose_tiles(M, d_model_p, d_ff_p,
                           in_itemsize, w_itemsize, out_itemsize, budget)
    M_p = _round_up(M, tm)

    # Per-call activation prep: cast to compute dtype, pad only if needed.
    x2d = x.reshape(M, d_model).astype(compute_dtype)
    if M_p != M or d_model_p != d_model:
        x2d = jnp.pad(x2d, ((0, M_p - M), (0, d_model_p - d_model)))

    num_i = M_p // tm
    num_k = d_ff_p // tk
    grid = (num_i, num_k)

    cost = pl.CostEstimate(
        flops=4 * M_p * d_model_p * d_ff_p,   # two matmuls
        transcendentals=0,
        bytes_accessed=(in_itemsize * x2d.size
                        + w_itemsize * (params["w1"].size + params["w2"].size) * num_i
                        + 4 * (params["b1"].size + params["b2"].size) * num_i
                        + out_itemsize * M_p * d_model_p))

    out2d = pl.pallas_call(
        ffn_kernel,
        out_shape=jax.ShapeDtypeStruct((M_p, d_model_p), out_dtype),
        grid_spec=pltpu.PrefetchScalarGridSpec(
            num_scalar_prefetch=0,
            grid=grid,
            in_specs=[
                pl.BlockSpec((tm, d_model_p), lambda i, k: (i, 0)),   # x rows (resident over k)
                pl.BlockSpec((d_model_p, tk), lambda i, k: (0, k)),   # W1 column tile
                pl.BlockSpec((1, tk), lambda i, k: (0, k)),           # b1 tile
                pl.BlockSpec((tk, d_model_p), lambda i, k: (k, 0)),   # W2 row tile
                pl.BlockSpec((1, d_model_p), lambda i, k: (0, 0)),    # b2 (constant block)
            ],
            out_specs=pl.BlockSpec((tm, d_model_p), lambda i, k: (i, 0)),
            scratch_shapes=[pltpu.VMEM((tm, d_model_p), jnp.float32)],
        ),
        compiler_params=pltpu.CompilerParams(
            dimension_semantics=("parallel", "arbitrary"),
            vmem_limit_bytes=vmem_limit),
        cost_estimate=cost,
    )(x2d, params["w1"], params["b1"], params["w2"], params["b2"])

    out2d = out2d[:M, :d_model]
    return out2d.reshape(*lead, d_model)


# -----------------------------------------------------------------------------
# Init (mirrors the PyTorch __init__)
# -----------------------------------------------------------------------------
def init_params(key, d_model, d_ff, init_scale=1.0,
                use_forward_pass_rootL=False, depthmult=1.0,
                dtype=jnp.float32):
    """W1 ~ kaiming_normal(fan_in=d_model, gain=1) * init_scale, b1 = 0
       W2 ~ kaiming_normal(fan_in=d_ff, gain=sqrt(2)) * init_scale
            (* 1/sqrt(depthmult) if not use_forward_pass_rootL), b2 = 0.
       Stored transposed (in_dim, out_dim) for row-major matmuls."""
    k1, k2 = jax.random.split(key)
    std1 = 1.0 / math.sqrt(d_model)                 # nonlinearity='linear'
    std2 = math.sqrt(2.0) / math.sqrt(d_ff)         # nonlinearity='relu'
    w1 = jax.random.normal(k1, (d_model, d_ff), dtype) * std1 * init_scale
    w2 = jax.random.normal(k2, (d_ff, d_model), dtype) * std2 * init_scale
    if not use_forward_pass_rootL:
        w2 = w2 * (1.0 / math.sqrt(depthmult))
    b1 = jnp.zeros((d_ff,), dtype)
    b2 = jnp.zeros((d_model,), dtype)
    return w1, b1, w2, b2


if __name__ == "__main__":
    # Small but lane-dense demo shapes (d_model multiple of 128).
    batch, seq, d_model, d_ff = 2, 8, 128, 256
    key = jax.random.PRNGKey(0)
    kx, kp = jax.random.split(key)
    x = jax.random.normal(kx, (batch, seq, d_model), jnp.float32)
    w1, b1, w2, b2 = init_params(kp, d_model, d_ff,
                                 init_scale=1.0, depthmult=1.0)

    params = prepare_ffn_params(w1, b1, w2, b2, compute_dtype=jnp.bfloat16)
    out = feed_forward(x, params)
    out = jax.block_until_ready(out)
    assert out.shape == (batch, seq, d_model)

    # Reference 1: same bf16 compute path (bf16 operands, f32 accumulation).
    xb = x.reshape(-1, d_model).astype(jnp.bfloat16)
    w1b = w1.astype(jnp.bfloat16)
    w2b = w2.astype(jnp.bfloat16)
    hb = jnp.maximum(
        jnp.dot(xb, w1b, preferred_element_type=jnp.float32) + b1, 0.0)
    ref_bf16 = (jnp.dot(hb.astype(jnp.bfloat16), w2b,
                        preferred_element_type=jnp.float32)
                + b2).reshape(batch, seq, d_model)

    # Reference 2: full-precision f32 (looser tolerance — bf16 MXU path).
    hp = jax.lax.Precision.HIGHEST
    x2 = x.reshape(-1, d_model)
    ref_f32 = jnp.maximum(jnp.dot(x2, w1, precision=hp) + b1, 0.0)
    ref_f32 = (jnp.dot(ref_f32, w2, precision=hp)
               + b2).reshape(batch, seq, d_model)

    assert jnp.allclose(out, ref_bf16, atol=1e-2, rtol=1e-2)
    assert jnp.allclose(out, ref_f32, atol=5e-2, rtol=5e-2)
    print("KERNEL_OK")
</pallas_src>

<mosaic_0001>
module attributes {stable_mosaic.version = 11 : i64} {
  func.func @ffn_kernel(%arg0: i32, %arg1: i32, %arg2: memref<128x128xbf16, #tpu.memory_space<vmem>>, %arg3: memref<128x256xbf16, #tpu.memory_space<vmem>>, %arg4: memref<1x256xf32, #tpu.memory_space<vmem>>, %arg5: memref<256x128xbf16, #tpu.memory_space<vmem>>, %arg6: memref<1x128xf32, #tpu.memory_space<vmem>>, %arg7: memref<128x128xf32, #tpu.memory_space<vmem>>, %arg8: memref<128x128xf32, #tpu.memory_space<vmem>>) attributes {dimension_semantics = [#tpu.dimension_semantics<parallel>, #tpu.dimension_semantics<arbitrary>], iteration_bounds = array<i64: 1, 1>, scalar_prefetch = 0 : i64, scratch_operands = 1 : i64, tpu.core_type = #tpu.core_type<tc>, window_params = [{transform_indices = @transform_0, window_bounds = array<i64: 128, 128>}, {transform_indices = @transform_1, window_bounds = array<i64: 128, 256>}, {transform_indices = @transform_2, window_bounds = array<i64: 1, 256>}, {transform_indices = @transform_3, window_bounds = array<i64: 256, 128>}, {pipeline_mode = #tpu.pipeline_mode<synchronous>, transform_indices = @transform_4, window_bounds = array<i64: 1, 128>}, {transform_indices = @transform_5, window_bounds = array<i64: 128, 128>}]} {
    %c0_i32 = arith.constant 0 : i32
    %0 = arith.cmpi eq, %arg1, %c0_i32 : i32
    %1 = arith.extui %0 : i1 to i32
    %c0_i32_0 = arith.constant 0 : i32
    %2 = arith.cmpi ne, %1, %c0_i32_0 : i32
    scf.if %2 {
      %c0_16 = arith.constant 0 : index
      %c0_17 = arith.constant 0 : index
      %20 = vector.load %arg6[%c0_16, %c0_17] : memref<1x128xf32, #tpu.memory_space<vmem>>, vector<1x128xf32>
      %21 = vector.shape_cast %20 : vector<1x128xf32> to vector<1x128xf32>
      %22 = vector.broadcast %21 : vector<1x128xf32> to vector<128x128xf32>
      %c0_18 = arith.constant 0 : index
      %c0_19 = arith.constant 0 : index
      %23 = vector.load %arg8[%c0_18, %c0_19] : memref<128x128xf32, #tpu.memory_space<vmem>>, vector<128x128xf32>
      tpu.vector_store %arg8[%c0_18, %c0_19], %22 {strides = array<i32>} : memref<128x128xf32, #tpu.memory_space<vmem>>, vector<128x128xf32>,
    } else {
    }
    %c0 = arith.constant 0 : index
    %c0_1 = arith.constant 0 : index
    %3 = vector.load %arg2[%c0, %c0_1] : memref<128x128xbf16, #tpu.memory_space<vmem>>, vector<128x128xbf16>
    %c0_2 = arith.constant 0 : index
    %c0_3 = arith.constant 0 : index
    %4 = vector.load %arg3[%c0_2, %c0_3] : memref<128x256xbf16, #tpu.memory_space<vmem>>, vector<128x256xbf16>
    %cst = arith.constant dense<0.000000e+00> : vector<128x256xf32>
    %5 = tpu.matmul %3, %4, %cst {dimension_numbers = #tpu.dot_dimension_numbers<[1], [0], [0], [1], [0, 0, 1, 1], [], []>} : vector<128x128xbf16>, vector<128x256xbf16>, vector<128x256xf32> -> vector<128x256xf32>
    %c0_4 = arith.constant 0 : index
    %c0_5 = arith.constant 0 : index
    %6 = vector.load %arg4[%c0_4, %c0_5] : memref<1x256xf32, #tpu.memory_space<vmem>>, vector<1x256xf32>
    %7 = vector.broadcast %6 : vector<1x256xf32> to vector<128x256xf32>
    %8 = arith.addf %5, %7 : vector<128x256xf32>
    %cst_6 = arith.constant 0.000000e+00 : f32
    %9 = vector.broadcast %cst_6 : f32 to vector<128x256xf32>
    %10 = arith.maximumf %8, %9 : vector<128x256xf32>
    %c0_7 = arith.constant 0 : index
    %c0_8 = arith.constant 0 : index
    %11 = vector.load %arg8[%c0_7, %c0_8] : memref<128x128xf32, #tpu.memory_space<vmem>>, vector<128x128xf32>
    %12 = arith.truncf %10 : vector<128x256xf32> to vector<128x256xbf16>
    %c0_9 = arith.constant 0 : index
    %c0_10 = arith.constant 0 : index
    %13 = vector.load %arg5[%c0_9, %c0_10] : memref<256x128xbf16, #tpu.memory_space<vmem>>, vector<256x128xbf16>
    %cst_11 = arith.constant dense<0.000000e+00> : vector<128x128xf32>
    %14 = tpu.matmul %12, %13, %cst_11 {dimension_numbers = #tpu.dot_dimension_numbers<[1], [0], [0], [1], [0, 0, 1, 1], [], []>} : vector<128x256xbf16>, vector<256x128xbf16>, vector<128x128xf32> -> vector<128x128xf32>
    %15 = arith.addf %11, %14 : vector<128x128xf32>
    %c0_12 = arith.constant 0 : index
    %c0_13 = arith.constant 0 : index
    %16 = vector.load %arg8[%c0_12, %c0_13] : memref<128x128xf32, #tpu.memory_space<vmem>>, vector<128x128xf32>
    tpu.vector_store %arg8[%c0_12, %c0_13], %15 {strides = array<i32>} : memref<128x128xf32, #tpu.memory_space<vmem>>, vector<128x128xf32>,
    %c0_i32_14 = arith.constant 0 : i32
    %17 = arith.cmpi eq, %arg1, %c0_i32_14 : i32
    %18 = arith.extui %17 : i1 to i32
    %c0_i32_15 = arith.constant 0 : i32
    %19 = arith.cmpi ne, %18, %c0_i32_15 : i32
    scf.if %19 {
      %c0_16 = arith.constant 0 : index
      %c0_17 = arith.constant 0 : index
      %20 = vector.load %arg8[%c0_16, %c0_17] : memref<128x128xf32, #tpu.memory_space<vmem>>, vector<128x128xf32>
      %c0_18 = arith.constant 0 : index
      %c0_19 = arith.constant 0 : index
      %21 = vector.load %arg7[%c0_18, %c0_19] : memref<128x128xf32, #tpu.memory_space<vmem>>, vector<128x128xf32>
      tpu.vector_store %arg7[%c0_18, %c0_19], %20 {strides = array<i32>} : memref<128x128xf32, #tpu.memory_space<vmem>>, vector<128x128xf32>,
    } else {
    }
    return
  }
  func.func @transform_0(%arg0: i32, %arg1: i32) -> (i32, i32) {
    %c0_i32 = arith.constant 0 : i32
    %c0_i32_0 = arith.constant 0 : i32
    return %arg0, %c0_i32 : i32, i32
  }
  func.func @transform_1(%arg0: i32, %arg1: i32) -> (i32, i32) {
    %c0_i32 = arith.constant 0 : i32
    %c0_i32_0 = arith.constant 0 : i32
    return %c0_i32, %arg1 : i32, i32
  }
  func.func @transform_2(%arg0: i32, %arg1: i32) -> (i32, i32) {
    %c0_i32 = arith.constant 0 : i32
    %c0_i32_0 = arith.constant 0 : i32
    return %c0_i32, %arg1 : i32, i32
  }
  func.func @transform_3(%arg0: i32, %arg1: i32) -> (i32, i32) {
    %c0_i32 = arith.constant 0 : i32
    %c0_i32_0 = arith.constant 0 : i32
    return %arg1, %c0_i32 : i32, i32
  }
  func.func @transform_4(%arg0: i32, %arg1: i32) -> (i32, i32) {
    %c0_i32 = arith.constant 0 : i32
    %c0_i32_0 = arith.constant 0 : i32
    %c0_i32_1 = arith.constant 0 : i32
    return %c0_i32, %c0_i32_0 : i32, i32
  }
  func.func @transform_5(%arg0: i32, %arg1: i32) -> (i32, i32) {
    %c0_i32 = arith.constant 0 : i32
    %c0_i32_0 = arith.constant 0 : i32
    return %arg0, %c0_i32 : i32, i32
  }
}

</mosaic_0001>

<bundles_post_ra>
// kernel: tpu_custom_call.1
= control target key start
LH: loop header
LB: loop body
LE: loop exit
PB: predicated region body
PF: predicated region fallthrough
CT: control target
= control target key end

     0   :  { %10 = vsyncpa [#allocation4], 0  ;;  %s1122_s0 = inlined_call_operand.hbm [shape: bf16[128,128], index: 0, kind: input, shape index: {}]   ;;  %s1123_s1 = inlined_call_operand.hbm [shape: bf16[128,256], index: 1, kind: input, shape index: {}]   ;;  %s1124_s2 = inlined_call_operand.vmem [shape: f32[1,256], index: 2, kind: input, shape index: {}]   ;;  %s1125_s3 = inlined_call_operand.hbm [shape: bf16[256,128], index: 3, kind: input, shape index: {}]   ;;  %s1126_s4 = inlined_call_operand.vmem [shape: f32[1,128], index: 4, kind: input, shape index: {}]   ;;  %s1127_s5 = inlined_call_operand.hbm [shape: f32[128,128], index: 5, kind: output, shape index: {}]  }
   0x1   :  { %11 = vsyncpa [#allocation7], 0 }
   0x2   :  { %12 = vsyncpa [#allocation5], 0  ;;  %s997_s18 = smov [#allocation6]  }
   0x3   :  { %s30_s19 = sshll.u32 %s997_s18, 4  ;;  %s31_s19 = int_to_ptr.vmem [resolvable:$true] %s30_s19 }
   0x4   :  { %s919_s20 = scalar_lea.vmem %s31_s19, 2048  ;;  %p924_p1 = scmp.lt.s32.totalorder %s31_s19, %s31_s19 }
   0x5   :  { %p920_p0 = scmp.ne.s32.totalorder %s31_s19, %s919_s20  ;;  %p925_p2 = scmp.lt.s32.totalorder %s919_s20, %s919_s20 }
   0x7   :  { %p926_p3 = por %p925_p2, %p924_p1 }
   0x9   :  { %p927_p4 = pnand %p926_p3, %p920_p0 }
   0xb   :  { %930 = shalt.err (!%p927_p4)
}
   0xc   :  { %s998_s21 = smov 128   ;;  %s999_s22 = smov 8  }
   0xd   :  { %36 = dma.hbm_to_vmem [thread:$0]  %s1123_s1, 2048, %s31_s19, [#allocation7], %s998_s21, %s998_s21, %s999_s22  }
   0xe   :  { %s1000_s25 = smov [#allocation3]  }
   0xf   :  { %s18_s26 = sshll.u32 %s1000_s25, 4  ;;  %s19_s26 = int_to_ptr.vmem [resolvable:$true] %s18_s26 }
  0x10   :  { %s939_s27 = scalar_lea.vmem %s19_s26, 1024  ;;  %p944_p6 = scmp.lt.s32.totalorder %s19_s26, %s19_s26 }
  0x11   :  { %p940_p5 = scmp.ne.s32.totalorder %s19_s26, %s939_s27  ;;  %p945_p7 = scmp.lt.s32.totalorder %s939_s27, %s939_s27 }
  0x13   :  { %p946_p8 = por %p945_p7, %p944_p6 }
  0x15   :  { %p947_p9 = pnand %p946_p8, %p940_p5 }
  0x17   :  { %950 = shalt.err (!%p947_p9)
}
  0x18   :  { %s1001_s28 = smov 64   ;;  %s1002_s29 = smov 4  }
  0x19   :  { %24 = dma.hbm_to_vmem [thread:$0]  %s1122_s0, 1024, %s19_s26, [#allocation4], %s1001_s28, %s1001_s28, %s1002_s29  }
  0x1a   :  { %s1003_s7 = smov [#allocation8]  }
  0x1b   :  { %s44_s8 = sshll.u32 %s1003_s7, 4  ;;  %s45_s8 = int_to_ptr.vmem [resolvable:$true] %s44_s8 }
  0x1c   :  { %s959_s1 = scalar_lea.vmem %s45_s8, 2048  ;;  %p964_p11 = scmp.lt.s32.totalorder %s45_s8, %s45_s8 }
  0x1d   :  { %p960_p10 = scmp.ne.s32.totalorder %s45_s8, %s959_s1  ;;  %p965_p12 = scmp.lt.s32.totalorder %s959_s1, %s959_s1 }
  0x1f   :  { %p966_p13 = por %p965_p12, %p964_p11 }
  0x21   :  { %p967_p0 = pnand %p966_p13, %p960_p10 }
  0x23   :  { %970 = shalt.err (!%p967_p0)
}
  0x24   :  { %50 = dma.hbm_to_vmem [thread:$0]  %s1125_s3, 2048, %s45_s8, [#allocation7], %s1001_s28, %s1001_s28, %s1002_s29  }
  0x25   :  { %991 = dma.done.wait [#allocation4], 1024  }
  0x26   :  { %992 = vsyncadd [#allocation4], 4294966272 }
  0x27   :  { %993 = dma.done.wait [#allocation7], 4096  }
  0x28   :  { %994 = vsyncadd [#allocation7], 4294963200  ;;  %v1004_v0 = vmov 0   ;;  %v863_v1 = vld [vmem:[#allocation6 + $0x74] ss:$8 sps:$4 sm:$0xff]   ;;  %v899_v19 = vld [vmem:[#allocation8 + $0x68] sm:$0xff]   ;;  %v124_v41 = vlaneseq }
  0x29   :  { %294 = vmatprep.mubr.bf16.mxu0 %v1004_v0  ;;  %v865_v2 = vld [vmem:[#allocation6 + $0x70] ss:$8 sps:$4 sm:$0xff]   ;;  %262 = vmatprep.subr.bf16.mxu0 %v863_v1  ;;  %v866_v3 = vld [vmem:[#allocation6 + $0x64] ss:$8 sps:$4 sm:$0xff]   ;;  %v868_v4 = vld [vmem:[#allocation6 + $0x60] ss:$8 sps:$4 sm:$0xff]  }
  0x2a   :  { %263 = vmatpush1.bf16.msra.mxu0 %v865_v2  ;;  %v869_v5 = vld [vmem:[#allocation6 + $0x54] ss:$8 sps:$4 sm:$0xff]   ;;  %v871_v6 = vld [vmem:[#allocation6 + $0x50] ss:$8 sps:$4 sm:$0xff]   ;;  %v872_v7 = vld [vmem:[#allocation6 + $0x44] ss:$8 sps:$4 sm:$0xff]  }
  0x2b   :  { %264 = vmatprep.subr.bf16.mxu0 %v866_v3  ;;  %v874_v8 = vld [vmem:[#allocation6 + $0x40] ss:$8 sps:$4 sm:$0xff]   ;;  %v875_v9 = vld [vmem:[#allocation6 + $0x34] ss:$8 sps:$4 sm:$0xff]   ;;  %v877_v10 = vld [vmem:[#allocation6 + $0x30] ss:$8 sps:$4 sm:$0xff]  }
  0x2c   :  { %v878_v11 = vld [vmem:[#allocation6 + $0x24] ss:$8 sps:$4 sm:$0xff]   ;;  %v880_v12 = vld [vmem:[#allocation6 + $0x20] ss:$8 sps:$4 sm:$0xff]   ;;  %v881_v13 = vld [vmem:[#allocation6 + $0x14] ss:$8 sps:$4 sm:$0xff]  }
  0x2d   :  { %v895_v14 = vld [vmem:[#allocation8 + $0x78] sm:$0xff]   ;;  %v897_v17 = vld [vmem:[#allocation8 + $0x70] sm:$0xff]   ;;  %v884_v20 = vld [vmem:[#allocation6 + $0x4] ss:$8 sps:$4 sm:$0xff]   ;;  %v125_v42 = vshrl.u32 %v124_v41, 7 }
  0x2e   :  { %265 = vmatpush1.bf16.msra.mxu0 %v868_v4  ;;  %v896_v15 = vld [vmem:[#allocation8 + $0x38] sm:$0xff]   ;;  %790 = vmatprep.subr.bf16.mxu1 %v895_v14  ;;  %v898_v18 = vld [vmem:[#allocation8 + $0x30] sm:$0xff]   ;;  %v886_v21 = vld [vmem:[#allocation6] ss:$8 sps:$4 sm:$0xff]  }
  0x2f   :  { %266 = vmatprep.subr.bf16.mxu0 %v869_v5  ;;  %v883_v16 = vld [vmem:[#allocation6 + $0x10] ss:$8 sps:$4 sm:$0xff]   ;;  %791 = vmatpush3.bf16.msra.mxu1 %v896_v15  ;;  %v900_v22 = vld [vmem:[#allocation8 + $0x28] sm:$0xff]   ;;  %v901_v23 = vld [vmem:[#allocation8 + $0x60] sm:$0xff]   ;;  %v130_v43 = vsub.s32 1, %v125_v42  ;;  %v126_v44 = vsub.s32 0, %v125_v42 }
  0x30   :  { %792 = vmatprep.subr.bf16.mxu1 %v897_v17  ;;  %v887_v24 = vld [vmem:[#allocation3] sm:$0xff]   ;;  %v903_v26 = vld [vmem:[#allocation8 + $0x58] sm:$0xff]   ;;  %v888_v28 = vld [vmem:[#allocation3 + $0x8] sm:$0xff]  }
  0x31   :  { %v902_v25 = vld [vmem:[#allocation8 + $0x20] sm:$0xff]   ;;  %v904_v27 = vld [vmem:[#allocation8 + $0x18] sm:$0xff]   ;;  %v889_v29 = vld [vmem:[#allocation3 + $0x10] sm:$0xff]  }
  0x32   :  { %267 = vmatpush1.bf16.msra.mxu0 %v871_v6  ;;  %v890_v30 = vld [vmem:[#allocation3 + $0x18] sm:$0xff]   ;;  %v891_v31 = vld [vmem:[#allocation3 + $0x20] sm:$0xff]   ;;  %v892_v32 = vld [vmem:[#allocation3 + $0x28] sm:$0xff]  }
  0x33   :  { %268 = vmatprep.subr.bf16.mxu0 %v872_v7  ;;  %793 = vmatpush3.bf16.msra.mxu1 %v898_v18  ;;  %v893_v33 = vld [vmem:[#allocation3 + $0x30] sm:$0xff]   ;;  %v894_v34 = vld [vmem:[#allocation3 + $0x38] sm:$0xff]   ;;  %v907_v37 = vld [vmem:[#allocation8 + $0x48] sm:$0xff]  }
  0x34   :  { %794 = vmatprep.subr.bf16.mxu1 %v899_v19  ;;  %v905_v35 = vld [vmem:[#allocation8 + $0x50] sm:$0xff]   ;;  %v908_v38 = vld [vmem:[#allocation8 + $0x8] sm:$0xff]   ;;  %v909_v39 = vld [vmem:[#allocation8 + $0x40] sm:$0xff]  }
  0x35   :  { %v906_v36 = vld [vmem:[#allocation8 + $0x10] sm:$0xff]   ;;  %v910_v40 = vld [vmem:[#allocation8] sm:$0xff]  }
  0x36   :  { %269 = vmatpush1.bf16.msra.mxu0 %v874_v8  ;;  %v122_v45 = vld [vmem:[%s1124_s2] sm:$0x3] }
  0x37   :  { %270 = vmatprep.subr.bf16.mxu0 %v875_v9  ;;  %795 = vmatpush3.bf16.msra.mxu1 %v900_v22  ;;  %v1059_v47 = vrot.slane %v122_v45, %v130_v43  ;;  %v1061_v48 = vrot.slane %v122_v45, %v126_v44 }
  0x38   :  { %796 = vmatprep.subr.bf16.mxu1 %v901_v23 }
  0x3a   :  { %271 = vmatpush1.bf16.msra.mxu0 %v877_v10 }
  0x3b   :  { %272 = vmatprep.subr.bf16.mxu0 %v878_v11  ;;  %797 = vmatpush3.bf16.msra.mxu1 %v902_v25 }
  0x3c   :  { %798 = vmatprep.subr.bf16.mxu1 %v903_v26 }
  0x3e   :  { %273 = vmatpush1.bf16.msra.mxu0 %v880_v12 }
  0x3f   :  { %274 = vmatprep.subr.bf16.mxu0 %v881_v13  ;;  %799 = vmatpush3.bf16.msra.mxu1 %v904_v27 }
  0x40   :  { %800 = vmatprep.subr.bf16.mxu1 %v905_v35 }
  0x42   :  { %275 = vmatpush1.bf16.msra.mxu0 %v883_v16 }
  0x43   :  { %276 = vmatprep.subr.bf16.mxu0 %v884_v20  ;;  %801 = vmatpush3.bf16.msra.mxu1 %v906_v36 }
  0x44   :  { %802 = vmatprep.subr.bf16.mxu1 %v907_v37 }
  0x46   :  { %277 = vmatpush1.bf16.msra.mxu0 %v886_v21 }
  0x47   :  { %803 = vmatpush3.bf16.msra.mxu1 %v908_v38 }
  0x48   :  { %804 = vmatprep.subr.bf16.mxu1 %v909_v39 }
  0x49   :  { %295 = vmatmul.mubr.bf16.vlgmr.msra.gmra.mxu0 %v887_v24 }
  0x4a   :  { %304 = vmatprep.mubr.bf16.mxu0 %v1004_v0 }
  0x4b   :  { %805 = vmatpush3.bf16.msra.mxu1 %v910_v40 }
  0x51   :  { %305 = vmatmul.mubr.bf16.gmra.mxu0 %v888_v28 }
  0x52   :  { %314 = vmatprep.mubr.bf16.mxu0 %v1004_v0 }
  0x59   :  { %315 = vmatmul.mubr.bf16.gmra.mxu0 %v889_v29 }
  0x5a   :  { %324 = vmatprep.mubr.bf16.mxu0 %v1004_v0 }
  0x61   :  { %325 = vmatmul.mubr.bf16.gmra.mxu0 %v890_v30 }
  0x62   :  { %334 = vmatprep.mubr.bf16.mxu0 %v1004_v0 }
  0x69   :  { %335 = vmatmul.mubr.bf16.gmra.mxu0 %v891_v31 }
  0x6a   :  { %344 = vmatprep.mubr.bf16.mxu0 %v1004_v0 }
  0x71   :  { %345 = vmatmul.mubr.bf16.gmra.mxu0 %v892_v32 }
  0x72   :  { %354 = vmatprep.mubr.bf16.mxu0 %v1004_v0 }
  0x79   :  { %355 = vmatmul.mubr.bf16.gmra.mxu0 %v893_v33 }
  0x7a   :  { %364 = vmatprep.mubr.bf16.mxu0 %v1004_v0 }
  0x81   :  { %365 = vmatmul.mubr.bf16.gmra.mxu0 %v894_v34 }
 0x109   :  { %v296_v46 = vpop.f32.mrf.mxu0 }
 0x10a   :  { %v297_v53 = vadd.f32 %v296_v46, %v1061_v48 }
 0x10b   :  { %v298_v49 = vpop.f32.mrf.mxu0 }
 0x10c   :  { %v299_v51 = vadd.f32 %v298_v49, %v1059_v47  ;;  %v375_v60 = vmax.f32 %v297_v53, 0.0 }
 0x10d   :  { %v300_v50 = vpop.f32.mrf.mxu0 }
 0x10e   :  { %v301_v52 = vadd.f32 %v300_v50, %v1061_v48  ;;  %v376_v58 = vmax.f32 %v299_v51, 0.0 }
 0x10f   :  { %v302_v54 = vpop.f32.mrf.mxu0 }
 0x110   :  { %v303_v55 = vadd.f32 %v302_v54, %v1059_v47  ;;  %v377_v56 = vmax.f32 %v301_v52, 0.0 }
 0x111   :  { %v306_v57 = vpop.f32.mrf.mxu0 }
 0x112   :  { %v378_v59 = vmax.f32 %v303_v55, 0.0  ;;  %v423_v63 = vpack.c.bf16 %v377_v56, %v375_v60  ;;  %v307_v3 = vadd.f32 %v306_v57, %v1061_v48 }
 0x113   :  { %v308_v61 = vpop.f32.mrf.mxu0 }
 0x114   :  { %v424_v62 = vpack.c.bf16 %v378_v59, %v376_v58  ;;  %v309_v1 = vadd.f32 %v308_v61, %v1059_v47  ;;  %v379_v10 = vmax.f32 %v307_v3, 0.0 }
 0x115   :  { %v310_v0 = vpop.f32.mrf.mxu0 }
 0x116   :  { %v311_v2 = vadd.f32 %v310_v0, %v1061_v48  ;;  %599 = vmatprep.mubr.bf16.mxu1 %v424_v62  ;;  %v380_v8 = vmax.f32 %v309_v1, 0.0 }
 0x117   :  { %v312_v4 = vpop.f32.mrf.mxu0  ;;  %600 = vmatmul.mubr.bf16.vlgmr.msra.gmra.mxu1 %v423_v63 }
 0x118   :  { %v313_v5 = vadd.f32 %v312_v4, %v1059_v47  ;;  %v381_v6 = vmax.f32 %v311_v2, 0.0 }
 0x119   :  { %v316_v7 = vpop.f32.mrf.mxu0 }
 0x11a   :  { %v382_v9 = vmax.f32 %v313_v5, 0.0  ;;  %v425_v13 = vpack.c.bf16 %v381_v6, %v379_v10  ;;  %v317_v17 = vadd.f32 %v316_v7, %v1061_v48 }
 0x11b   :  { %v318_v11 = vpop.f32.mrf.mxu0 }
 0x11c   :  { %v426_v12 = vpack.c.bf16 %v382_v9, %v380_v8  ;;  %v319_v15 = vadd.f32 %v318_v11, %v1059_v47  ;;  %v383_v24 = vmax.f32 %v317_v17, 0.0 }
 0x11d   :  { %v320_v14 = vpop.f32.mrf.mxu0 }
 0x11e   :  { %v321_v16 = vadd.f32 %v320_v14, %v1061_v48  ;;  %607 = vmatprep.mubr.bf16.mxu1 %v426_v12  ;;  %v384_v22 = vmax.f32 %v319_v15, 0.0 }
 0x11f   :  { %v322_v18 = vpop.f32.mrf.mxu0  ;;  %608 = vmatmul.mubr.bf16.gmra.mxu1 %v425_v13 }
 0x120   :  { %v323_v19 = vadd.f32 %v322_v18, %v1059_v47  ;;  %v385_v20 = vmax.f32 %v321_v16, 0.0 }
 0x121   :  { %v326_v21 = vpop.f32.mrf.mxu0 }
 0x122   :  { %v386_v23 = vmax.f32 %v323_v19, 0.0  ;;  %v427_v27 = vpack.c.bf16 %v385_v20, %v383_v24  ;;  %v327_v31 = vadd.f32 %v326_v21, %v1061_v48 }
 0x123   :  { %v328_v25 = vpop.f32.mrf.mxu0 }
 0x124   :  { %v428_v26 = vpack.c.bf16 %v386_v23, %v384_v22  ;;  %v329_v29 = vadd.f32 %v328_v25, %v1059_v47  ;;  %v387_v38 = vmax.f32 %v327_v31, 0.0 }
 0x125   :  { %v330_v28 = vpop.f32.mrf.mxu0 }
 0x126   :  { %v331_v30 = vadd.f32 %v330_v28, %v1061_v48  ;;  %615 = vmatprep.mubr.bf16.mxu1 %v428_v26  ;;  %v388_v36 = vmax.f32 %v329_v29, 0.0 }
 0x127   :  { %v332_v32 = vpop.f32.mrf.mxu0  ;;  %616 = vmatmul.mubr.bf16.gmra.mxu1 %v427_v27 }
 0x128   :  { %v333_v33 = vadd.f32 %v332_v32, %v1059_v47  ;;  %v389_v34 = vmax.f32 %v331_v30, 0.0 }
 0x129   :  { %v336_v35 = vpop.f32.mrf.mxu0 }
 0x12a   :  { %v390_v37 = vmax.f32 %v333_v33, 0.0  ;;  %v429_v41 = vpack.c.bf16 %v389_v34, %v387_v38  ;;  %v337_v45 = vadd.f32 %v336_v35, %v1061_v48  ;;  %v1098_v35 = vld [vmem:[%s1126_s4] ss:$0 sm:$0xff]  ;;  %s1005_s4 = smov [#allocation9]  }
 0x12b   :  { %v338_v39 = vpop.f32.mrf.mxu0  ;;  %s736_s12 = sshll.u32 %s1005_s4, 4  ;;  %s737_s12 = int_to_ptr.vmem [resolvable:$true] %s736_s12 }
 0x12c   :  { %v430_v40 = vpack.c.bf16 %v390_v37, %v388_v36  ;;  %v339_v43 = vadd.f32 %v338_v39, %v1059_v47  ;;  %v391_v54 = vmax.f32 %v337_v45, 0.0  ;;  %s971_s13 = scalar_lea.vmem %s737_s12, 2048  ;;  %p976_p2 = scmp.lt.s32.totalorder %s737_s12, %s737_s12 }
 0x12d   :  { %v340_v42 = vpop.f32.mrf.mxu0  ;;  %p972_p1 = scmp.ne.s32.totalorder %s737_s12, %s971_s13  ;;  %p977_p3 = scmp.lt.s32.totalorder %s971_s13, %s971_s13 }
 0x12e   :  { %v341_v44 = vadd.f32 %v340_v42, %v1061_v48  ;;  %623 = vmatprep.mubr.bf16.mxu1 %v430_v40  ;;  %v392_v52 = vmax.f32 %v339_v43, 0.0 }
 0x12f   :  { %v342_v46 = vpop.f32.mrf.mxu0  ;;  %624 = vmatmul.mubr.bf16.gmra.mxu1 %v429_v41  ;;  %p978_p4 = por %p977_p3, %p976_p2 }
 0x130   :  { %v343_v49 = vadd.f32 %v342_v46, %v1059_v47  ;;  %v393_v50 = vmax.f32 %v341_v44, 0.0 }
 0x131   :  { %v346_v51 = vpop.f32.mrf.mxu0  ;;  %p979_p5 = pnand %p978_p4, %p972_p1 }
 0x132   :  { %v394_v53 = vmax.f32 %v343_v49, 0.0  ;;  %v431_v57 = vpack.c.bf16 %v393_v50, %v391_v54  ;;  %v347_v61 = vadd.f32 %v346_v51, %v1061_v48 }
 0x133   :  { %v348_v55 = vpop.f32.mrf.mxu0 }
 0x134   :  { %v432_v56 = vpack.c.bf16 %v394_v53, %v392_v52  ;;  %v349_v59 = vadd.f32 %v348_v55, %v1059_v47  ;;  %v395_v4 = vmax.f32 %v347_v61, 0.0 }
 0x135   :  { %v350_v58 = vpop.f32.mrf.mxu0 }
 0x136   :  { %v351_v60 = vadd.f32 %v350_v58, %v1061_v48  ;;  %631 = vmatprep.mubr.bf16.mxu1 %v432_v56  ;;  %v396_v2 = vmax.f32 %v349_v59, 0.0 }
 0x137   :  { %v352_v62 = vpop.f32.mrf.mxu0  ;;  %632 = vmatmul.mubr.bf16.gmra.mxu1 %v431_v57 }
 0x138   :  { %v353_v63 = vadd.f32 %v352_v62, %v1059_v47  ;;  %v397_v0 = vmax.f32 %v351_v60, 0.0 }
 0x139   :  { %v356_v1 = vpop.f32.mrf.mxu0 }
 0x13a   :  { %v398_v3 = vmax.f32 %v353_v63, 0.0  ;;  %v433_v7 = vpack.c.bf16 %v397_v0, %v395_v4  ;;  %v357_v11 = vadd.f32 %v356_v1, %v1061_v48 }
 0x13b   :  { %v358_v5 = vpop.f32.mrf.mxu0 }
 0x13c   :  { %v434_v6 = vpack.c.bf16 %v398_v3, %v396_v2  ;;  %v359_v9 = vadd.f32 %v358_v5, %v1059_v47  ;;  %v399_v18 = vmax.f32 %v357_v11, 0.0 }
 0x13d   :  { %v360_v8 = vpop.f32.mrf.mxu0 }
 0x13e   :  { %v361_v10 = vadd.f32 %v360_v8, %v1061_v48  ;;  %639 = vmatprep.mubr.bf16.mxu1 %v434_v6  ;;  %v400_v16 = vmax.f32 %v359_v9, 0.0 }
 0x13f   :  { %v362_v12 = vpop.f32.mrf.mxu0  ;;  %640 = vmatmul.mubr.bf16.gmra.mxu1 %v433_v7 }
 0x140   :  { %v363_v13 = vadd.f32 %v362_v12, %v1059_v47  ;;  %v401_v14 = vmax.f32 %v361_v10, 0.0 }
 0x141   :  { %v366_v15 = vpop.f32.mrf.mxu0 }
 0x142   :  { %v402_v17 = vmax.f32 %v363_v13, 0.0  ;;  %v435_v21 = vpack.c.bf16 %v401_v14, %v399_v18  ;;  %v367_v25 = vadd.f32 %v366_v15, %v1061_v48 }
 0x143   :  { %v368_v19 = vpop.f32.mrf.mxu0 }
 0x144   :  { %v436_v20 = vpack.c.bf16 %v402_v17, %v400_v16  ;;  %v369_v23 = vadd.f32 %v368_v19, %v1059_v47  ;;  %v403_v31 = vmax.f32 %v367_v25, 0.0 }
 0x145   :  { %v370_v22 = vpop.f32.mrf.mxu0 }
 0x146   :  { %v371_v24 = vadd.f32 %v370_v22, %v1061_v48  ;;  %647 = vmatprep.mubr.bf16.mxu1 %v436_v20  ;;  %v404_v29 = vmax.f32 %v369_v23, 0.0 }
 0x147   :  { %v372_v26 = vpop.f32.mrf.mxu0  ;;  %648 = vmatmul.mubr.bf16.gmra.mxu1 %v435_v21 }
 0x148   :  { %v373_v27 = vadd.f32 %v372_v26, %v1059_v47  ;;  %v405_v28 = vmax.f32 %v371_v24, 0.0 }
 0x14a   :  { %v406_v30 = vmax.f32 %v373_v27, 0.0  ;;  %v437_v33 = vpack.c.bf16 %v405_v28, %v403_v31 }
 0x14c   :  { %v438_v32 = vpack.c.bf16 %v406_v30, %v404_v29 }
 0x14e   :  { %655 = vmatprep.mubr.bf16.mxu1 %v438_v32 }
 0x14f   :  { %656 = vmatmul.mubr.bf16.gmra.mxu1 %v437_v33 }
 0x1d7   :  { %v806_v34 = vpop.f32.mrf.mxu1 }
 0x1d9   :  { %v807_v36 = vpop.f32.mrf.mxu1 }
 0x1da   :  { %v808_v48 = vadd.f32 %v807_v36, %v806_v34 }
 0x1db   :  { %v809_v37 = vpop.f32.mrf.mxu1 }
 0x1dc   :  { %v664_v38 = vadd.f32 %v808_v48, %v1098_v35 }
 0x1dd   :  { %v810_v47 = vpop.f32.mrf.mxu1 }
 0x1de   :  { %715 = vst [vmem:[#allocation9] sm:$0xff] %v664_v38  ;;  %v811_v39 = vadd.f32 %v810_v47, %v809_v37 }
 0x1df   :  { %v812_v40 = vpop.f32.mrf.mxu1 }
 0x1e0   :  { %v665_v41 = vadd.f32 %v811_v39, %v1098_v35 }
 0x1e1   :  { %v813_v42 = vpop.f32.mrf.mxu1 }
 0x1e2   :  { %716 = vst [vmem:[#allocation9 + $0x8] sm:$0xff] %v665_v41  ;;  %v814_v43 = vadd.f32 %v813_v42, %v812_v40 }
 0x1e3   :  { %v815_v44 = vpop.f32.mrf.mxu1 }
 0x1e4   :  { %v666_v45 = vadd.f32 %v814_v43, %v1098_v35 }
 0x1e5   :  { %v816_v46 = vpop.f32.mrf.mxu1 }
 0x1e6   :  { %717 = vst [vmem:[#allocation9 + $0x10] sm:$0xff] %v666_v45  ;;  %v817_v49 = vadd.f32 %v816_v46, %v815_v44 }
 0x1e7   :  { %v818_v50 = vpop.f32.mrf.mxu1 }
 0x1e8   :  { %v667_v51 = vadd.f32 %v817_v49, %v1098_v35 }
 0x1e9   :  { %v819_v52 = vpop.f32.mrf.mxu1 }
 0x1ea   :  { %718 = vst [vmem:[#allocation9 + $0x18] sm:$0xff] %v667_v51  ;;  %v820_v53 = vadd.f32 %v819_v52, %v818_v50 }
 0x1eb   :  { %v821_v54 = vpop.f32.mrf.mxu1 }
 0x1ec   :  { %v668_v55 = vadd.f32 %v820_v53, %v1098_v35 }
 0x1ed   :  { %v822_v56 = vpop.f32.mrf.mxu1 }
 0x1ee   :  { %719 = vst [vmem:[#allocation9 + $0x20] sm:$0xff] %v668_v55  ;;  %v823_v57 = vadd.f32 %v822_v56, %v821_v54 }
 0x1ef   :  { %v824_v58 = vpop.f32.mrf.mxu1 }
 0x1f0   :  { %v669_v59 = vadd.f32 %v823_v57, %v1098_v35 }
 0x1f1   :  { %v825_v60 = vpop.f32.mrf.mxu1 }
 0x1f2   :  { %720 = vst [vmem:[#allocation9 + $0x28] sm:$0xff] %v669_v59  ;;  %v826_v61 = vadd.f32 %v825_v60, %v824_v58 }
 0x1f3   :  { %v827_v62 = vpop.f32.mrf.mxu1 }
 0x1f4   :  { %v670_v63 = vadd.f32 %v826_v61, %v1098_v35 }
 0x1f5   :  { %v828_v0 = vpop.f32.mrf.mxu1 }
 0x1f6   :  { %721 = vst [vmem:[#allocation9 + $0x30] sm:$0xff] %v670_v63  ;;  %v829_v1 = vadd.f32 %v828_v0, %v827_v62 }
 0x1f7   :  { %v830_v2 = vpop.f32.mrf.mxu1 }
 0x1f8   :  { %v671_v3 = vadd.f32 %v829_v1, %v1098_v35 }
 0x1f9   :  { %v831_v4 = vpop.f32.mrf.mxu1 }
 0x1fa   :  { %722 = vst [vmem:[#allocation9 + $0x38] sm:$0xff] %v671_v3  ;;  %v832_v5 = vadd.f32 %v831_v4, %v830_v2 }
 0x1fb   :  { %v833_v6 = vpop.f32.mrf.mxu1 }
 0x1fc   :  { %v672_v7 = vadd.f32 %v832_v5, %v1098_v35 }
 0x1fd   :  { %v834_v8 = vpop.f32.mrf.mxu1 }
 0x1fe   :  { %723 = vst [vmem:[#allocation9 + $0x40] sm:$0xff] %v672_v7  ;;  %v835_v9 = vadd.f32 %v834_v8, %v833_v6 }
 0x1ff   :  { %v836_v10 = vpop.f32.mrf.mxu1 }
 0x200   :  { %v673_v11 = vadd.f32 %v835_v9, %v1098_v35 }
 0x201   :  { %v837_v12 = vpop.f32.mrf.mxu1 }
 0x202   :  { %724 = vst [vmem:[#allocation9 + $0x48] sm:$0xff] %v673_v11  ;;  %v838_v13 = vadd.f32 %v837_v12, %v836_v10 }
 0x203   :  { %v839_v14 = vpop.f32.mrf.mxu1 }
 0x204   :  { %v674_v15 = vadd.f32 %v838_v13, %v1098_v35 }
 0x205   :  { %v840_v16 = vpop.f32.mrf.mxu1 }
 0x206   :  { %725 = vst [vmem:[#allocation9 + $0x50] sm:$0xff] %v674_v15  ;;  %v841_v17 = vadd.f32 %v840_v16, %v839_v14 }
 0x207   :  { %v842_v18 = vpop.f32.mrf.mxu1 }
 0x208   :  { %v675_v19 = vadd.f32 %v841_v17, %v1098_v35 }
 0x209   :  { %v843_v20 = vpop.f32.mrf.mxu1 }
 0x20a   :  { %726 = vst [vmem:[#allocation9 + $0x58] sm:$0xff] %v675_v19  ;;  %v844_v21 = vadd.f32 %v843_v20, %v842_v18 }
 0x20b   :  { %v845_v22 = vpop.f32.mrf.mxu1 }
 0x20c   :  { %v676_v23 = vadd.f32 %v844_v21, %v1098_v35 }
 0x20d   :  { %v846_v24 = vpop.f32.mrf.mxu1 }
 0x20e   :  { %727 = vst [vmem:[#allocation9 + $0x60] sm:$0xff] %v676_v23  ;;  %v847_v25 = vadd.f32 %v846_v24, %v845_v22 }
 0x20f   :  { %v848_v26 = vpop.f32.mrf.mxu1 }
 0x210   :  { %v677_v27 = vadd.f32 %v847_v25, %v1098_v35 }
 0x211   :  { %v849_v28 = vpop.f32.mrf.mxu1 }
 0x212   :  { %728 = vst [vmem:[#allocation9 + $0x68] sm:$0xff] %v677_v27  ;;  %v850_v29 = vadd.f32 %v849_v28, %v848_v26 }
 0x213   :  { %v851_v30 = vpop.f32.mrf.mxu1 }
 0x214   :  { %v678_v31 = vadd.f32 %v850_v29, %v1098_v35 }
 0x215   :  { %v852_v32 = vpop.f32.mrf.mxu1 }
 0x216   :  { %729 = vst [vmem:[#allocation9 + $0x70] sm:$0xff] %v678_v31  ;;  %v853_v33 = vadd.f32 %v852_v32, %v851_v30 }
 0x218   :  { %v679_v34 = vadd.f32 %v853_v33, %v1098_v35 }
 0x21a   :  { %730 = vst [vmem:[#allocation9 + $0x78] sm:$0xff] %v679_v34 }
 0x21b   :  { %982 = shalt.err (!%p979_p5)
}
 0x21c   :  { %742 = dma.vmem_to_hbm [thread:$0]  %s737_s12, 2048, %s1127_s5, [#allocation5], %s998_s21, %s998_s21, %s999_s22  }
 0x21d   :  { %995 = dma.done.wait [#allocation5], 2048  }
 0x21e   :  { %996 = vsyncadd [#allocation5], 4294965248 }
 0x21f   :  { %746 = vsyncpa [#allocation4], 1 }
 0x220   :  { %747 = vsyncpa [#allocation7], 1 }
 0x221   :  { %748 = vsyncpa [#allocation5], 1 }

</bundles_post_ra>
